<compile_context>
chip_gen: v6e
topology: v6e:2x2x1
jax: 0.10.0
libtpu: 0.0.40
codegen_flags: <defaults>
</compile_context>

<pallas_src>
import numpy as np

import jax
import jax.numpy as jnp
from jax.experimental import pallas as pl
from jax.experimental.pallas import tpu as pltpu


# ----------------------------------------------------------------------------
# Kernel
# ----------------------------------------------------------------------------
def _prompt_kernel(ctx_ref, prefix_ref, suffix_ref, out_ref):
    bt, n_ctx, _ = ctx_ref.shape          # per-grid-step batch tile
    n_cls = prefix_ref.shape[0]
    odt = out_ref.dtype

    # Single load (and optional cast) of each input block; casts are free
    # filler under the DMA/store bound.
    pre = prefix_ref[...].astype(odt)     # (n_cls, D)          resident
    suf = suffix_ref[...].astype(odt)     # (n_cls*l_suf, D)    resident
    ctx = ctx_ref[...].astype(odt)        # (bt, n_ctx, D)      per grid step

    ctx_start = n_cls
    suf_start = n_cls * (1 + n_ctx)

    # Section 1 & 3: prefix rows [0, n_cls) and suffix rows [suf_start, S) are
    # identical for every batch row -> per-row stores of the resident slabs.
    # bt is static, so this unrolls into direct stores (no temporaries).
    for b in range(bt):
        out_ref[b, 0:n_cls, :] = pre
        out_ref[b, suf_start:, :] = suf

    # Section 2: ctx rows [n_cls, n_cls*(1+n_ctx)) -- the per-batch ctx block
    # repeated once per class.  Static per-class slice stores; when
    # n_cls % 8 == 0 and n_ctx % 8 == 0 every start offset is sublane-aligned.
    for c in range(n_cls):
        s = ctx_start + c * n_ctx
        out_ref[:, s:s + n_ctx, :] = ctx


# ----------------------------------------------------------------------------
# Tiling / VMEM budgeting
# ----------------------------------------------------------------------------
def _vmem_capacity_bytes():
    """Physical VMEM per TensorCore (128 MiB v5e/v6e, 64 MiB v7x)."""
    try:
        return int(pltpu.get_tpu_info().vmem_capacity_bytes)
    except Exception:
        return 64 * 1024 * 1024   # conservative fallback (v7x-sized)


def _pick_batch_tile(B, n_ctx, S, D, in_item, out_item, resident_bytes,
                     budget_bytes, min_steps):
    """Largest divisor of B whose *actual* VMEM need fits the budget.

    need(bt) accounts for double-buffered ctx input + double-buffered output
    blocks plus the resident prefix/suffix blocks (conservatively 2x, since we
    do not rely on single-buffering support for constant-index blocks).
    """
    def need(bt):
        return 2 * bt * D * (n_ctx * in_item + S * out_item) + resident_bytes

    divisors = [d for d in range(1, B + 1) if B % d == 0]
    divisors.sort(reverse=True)

    # Prefer >= min_steps grid steps (v7x megacore sharding + DMA pipelining).
    for bt in divisors:
        if need(bt) <= budget_bytes and B // bt >= min_steps:
            return bt, need(bt)
    # Relax the step requirement (e.g. B == 1), keep the budget.
    for bt in divisors:
        if need(bt) <= budget_bytes:
            return bt, need(bt)
    # Even bt = 1 exceeds the budget (enormous n_cls*S*D); take bt = 1 and let
    # vmem_limit_bytes be raised from the same arithmetic below.
    return 1, need(1)
    # TODO(synk): for prime/awkward B where bt degenerates to 1 at large B,
    # pad the batch in the wrapper (or use a when-guarded remainder tile)
    # instead of paying per-step overhead per batch row.


# ----------------------------------------------------------------------------
# Wrapper (PromptLearner.forward, 'end' branch, batched, not learned_cls)
# ----------------------------------------------------------------------------
def prompt_learner_forward(ctx, token_prefix, token_suffix, *, out_dtype=None):
    """Pallas implementation of PromptLearner.forward ('end', not learned_cls, batched).

    ctx:          (B, n_ctx, D)   learned context (nn.Parameter)
    token_prefix: (n_cls, 1, D)   [CLS]/BOS embedding per class (buffer)
    token_suffix: (n_cls, L, D)   class-name + padding embeddings (buffer)
    returns:      (B, n_cls*(1 + n_ctx + L), D)
    """
    B, n_ctx, D = ctx.shape
    n_cls = token_prefix.shape[0]
    l_suf = token_suffix.shape[1]
    S = n_cls * (1 + n_ctx + l_suf)
    out_dtype = ctx.dtype if out_dtype is None else out_dtype

    # Flatten prefix/suffix in the wrapper (free, contiguous merges in XLA) so
    # the kernel sees lane-dense 2-D slabs and never reshapes/relayouts.
    prefix2d = token_prefix.reshape(n_cls, D)
    suffix2d = token_suffix.reshape(n_cls * l_suf, D)

    in_item = np.dtype(ctx.dtype).itemsize
    out_item = np.dtype(out_dtype).itemsize

    capacity = _vmem_capacity_bytes()
    budget = capacity // 2                      # headroom for compiler scratch
    resident_bytes = 2 * (n_cls * D + n_cls * l_suf * D) * in_item
    min_steps = 2 if B >= 2 else 1              # keep both v7x TCs busy

    bt, vmem_need = _pick_batch_tile(B, n_ctx, S, D, in_item, out_item,
                                     resident_bytes, budget, min_steps)
    grid = (B // bt,)

    vmem_limit = int(min(capacity,
                         max(32 * 1024 * 1024, vmem_need + 4 * 1024 * 1024)))

    bytes_accessed = (
        B * n_ctx * D * in_item                       # ctx (read once)
        + (n_cls * D + n_cls * l_suf * D) * in_item   # prefix + suffix (resident)
        + B * S * D * out_item                        # output (write once)
    )
    cost = pl.CostEstimate(flops=0, transcendentals=0,
                           bytes_accessed=bytes_accessed)

    return pl.pallas_call(
        _prompt_kernel,
        out_shape=jax.ShapeDtypeStruct((B, S, D), out_dtype),
        grid_spec=pltpu.PrefetchScalarGridSpec(
            num_scalar_prefetch=0,
            grid=grid,
            in_specs=[
                pl.BlockSpec((bt, n_ctx, D), lambda b: (b, 0, 0)),       # per-batch ctx
                pl.BlockSpec((n_cls, D), lambda b: (0, 0)),              # resident prefix
                pl.BlockSpec((n_cls * l_suf, D), lambda b: (0, 0)),      # resident suffix
            ],
            out_specs=pl.BlockSpec((bt, S, D), lambda b: (b, 0, 0)),
        ),
        compiler_params=pltpu.CompilerParams(
            dimension_semantics=("parallel",),
            vmem_limit_bytes=vmem_limit,
        ),
        cost_estimate=cost,
    )(ctx, prefix2d, suffix2d)


# ----------------------------------------------------------------------------
# Pure-JAX reference (transcription of the PyTorch 'end' branch)
# ----------------------------------------------------------------------------
def _reference(ctx, token_prefix, token_suffix):
    B, n_ctx, D = ctx.shape
    n_cls = token_prefix.shape[0]
    ctx4 = jnp.broadcast_to(ctx[:, None, :, :], (B, n_cls, n_ctx, D)).reshape(B, -1, D)
    pre = jnp.tile(token_prefix, (B, 1, 1)).reshape(B, -1, D)
    suf = jnp.tile(token_suffix, (B, 1, 1)).reshape(B, -1, D)
    return jnp.concatenate([pre, ctx4, suf], axis=1)


if __name__ == "__main__":
    def run_case(B, n_cls, n_ctx, D, L_suf):
        key = jax.random.PRNGKey(0)
        k_ctx, k_emb = jax.random.split(key)

        # nn.Parameter ctx: nn.init.normal_(std=0.02), repeated over batch in __init__.
        ctx = 0.02 * jax.random.normal(k_ctx, (B, n_ctx, D), dtype=jnp.float32)

        # TODO(synk): the language_model / tokenizer / text_feat_map calls in
        # __init__ (BERT + feature projection) have no in-kernel equivalent;
        # their output embedding is synthesized deterministically instead.
        emb_len = 1 + n_ctx + L_suf
        embedding = jax.random.normal(k_emb, (n_cls, emb_len, D), dtype=jnp.float32)
        token_prefix = embedding[:, :1, :]            # (n_cls, 1, D)
        token_suffix = embedding[:, 1 + n_ctx:, :]    # (n_cls, L_suf, D)

        # Synthetic stand-in for self.text_dict returned alongside the prompts (glue).
        _text_dict = {"embedded": embedding}

        prompts = prompt_learner_forward(ctx, token_prefix, token_suffix)
        jax.block_until_ready(prompts)

        expected = _reference(ctx, token_prefix, token_suffix)
        assert prompts.shape == (B, n_cls * emb_len, D), prompts.shape
        assert jnp.array_equal(prompts, expected), "mismatch vs reference"

    # Primary: sublane-aligned n_cls (production GroundingDINO, n_cls=80, is
    # also a multiple of 8 -> every section start is an unmasked full store).
    run_case(B=2, n_cls=8, n_ctx=16, D=256, L_suf=8)
    # Secondary: misaligned n_cls exercises the masked-store path; still exact.
    run_case(B=2, n_cls=3, n_ctx=16, D=256, L_suf=8)

    print("KERNEL_OK")
</pallas_src>

<mosaic_0001>
module attributes {stable_mosaic.version = 11 : i64} {
  func.func @_prompt_kernel(%arg0: i32, %arg1: memref<1x16x256xf32, #tpu.memory_space<vmem>>, %arg2: memref<8x256xf32, #tpu.memory_space<vmem>>, %arg3: memref<64x256xf32, #tpu.memory_space<vmem>>, %arg4: memref<1x200x256xf32, #tpu.memory_space<vmem>>) attributes {dimension_semantics = [#tpu.dimension_semantics<parallel>], iteration_bounds = array<i64: 2>, scalar_prefetch = 0 : i64, scratch_operands = 0 : i64, tpu.core_type = #tpu.core_type<tc>, window_params = [{transform_indices = @transform_0, window_bounds = array<i64: 1, 16, 256>}, {pipeline_mode = #tpu.pipeline_mode<synchronous>, transform_indices = @transform_1, window_bounds = array<i64: 8, 256>}, {pipeline_mode = #tpu.pipeline_mode<synchronous>, transform_indices = @transform_2, window_bounds = array<i64: 64, 256>}, {transform_indices = @transform_3, window_bounds = array<i64: 1, 200, 256>}]} {
    %c0 = arith.constant 0 : index
    %c0_0 = arith.constant 0 : index
    %0 = vector.load %arg2[%c0, %c0_0] : memref<8x256xf32, #tpu.memory_space<vmem>>, vector<8x256xf32>
    %c0_1 = arith.constant 0 : index
    %c0_2 = arith.constant 0 : index
    %1 = vector.load %arg3[%c0_1, %c0_2] : memref<64x256xf32, #tpu.memory_space<vmem>>, vector<64x256xf32>
    %c0_3 = arith.constant 0 : index
    %c0_4 = arith.constant 0 : index
    %c0_5 = arith.constant 0 : index
    %2 = vector.load %arg1[%c0_3, %c0_4, %c0_5] : memref<1x16x256xf32, #tpu.memory_space<vmem>>, vector<1x16x256xf32>
    %c0_6 = arith.constant 0 : index
    %c0_7 = arith.constant 0 : index
    %c0_8 = arith.constant 0 : index
    %3 = vector.load %arg4[%c0_6, %c0_7, %c0_8] : memref<1x200x256xf32, #tpu.memory_space<vmem>>, vector<1x8x256xf32>
    %4 = vector.shape_cast %3 : vector<1x8x256xf32> to vector<8x256xf32>
    %5 = vector.shape_cast %0 : vector<8x256xf32> to vector<1x8x256xf32>
    tpu.vector_store %arg4[%c0_6, %c0_7, %c0_8], %5 {strides = array<i32>} : memref<1x200x256xf32, #tpu.memory_space<vmem>>, vector<1x8x256xf32>,
    %c0_9 = arith.constant 0 : index
    %c136 = arith.constant 136 : index
    %c0_10 = arith.constant 0 : index
    %6 = vector.load %arg4[%c0_9, %c136, %c0_10] : memref<1x200x256xf32, #tpu.memory_space<vmem>>, vector<1x64x256xf32>
    %7 = vector.shape_cast %6 : vector<1x64x256xf32> to vector<64x256xf32>
    %8 = vector.shape_cast %1 : vector<64x256xf32> to vector<1x64x256xf32>
    tpu.vector_store %arg4[%c0_9, %c136, %c0_10], %8 {strides = array<i32>} : memref<1x200x256xf32, #tpu.memory_space<vmem>>, vector<1x64x256xf32>,
    %c0_11 = arith.constant 0 : index
    %c8 = arith.constant 8 : index
    %c0_12 = arith.constant 0 : index
    %9 = vector.load %arg4[%c0_11, %c8, %c0_12] : memref<1x200x256xf32, #tpu.memory_space<vmem>>, vector<1x16x256xf32>
    tpu.vector_store %arg4[%c0_11, %c8, %c0_12], %2 {strides = array<i32>} : memref<1x200x256xf32, #tpu.memory_space<vmem>>, vector<1x16x256xf32>,
    %c0_13 = arith.constant 0 : index
    %c24 = arith.constant 24 : index
    %c0_14 = arith.constant 0 : index
    %10 = vector.load %arg4[%c0_13, %c24, %c0_14] : memref<1x200x256xf32, #tpu.memory_space<vmem>>, vector<1x16x256xf32>
    tpu.vector_store %arg4[%c0_13, %c24, %c0_14], %2 {strides = array<i32>} : memref<1x200x256xf32, #tpu.memory_space<vmem>>, vector<1x16x256xf32>,
    %c0_15 = arith.constant 0 : index
    %c40 = arith.constant 40 : index
    %c0_16 = arith.constant 0 : index
    %11 = vector.load %arg4[%c0_15, %c40, %c0_16] : memref<1x200x256xf32, #tpu.memory_space<vmem>>, vector<1x16x256xf32>
    tpu.vector_store %arg4[%c0_15, %c40, %c0_16], %2 {strides = array<i32>} : memref<1x200x256xf32, #tpu.memory_space<vmem>>, vector<1x16x256xf32>,
    %c0_17 = arith.constant 0 : index
    %c56 = arith.constant 56 : index
    %c0_18 = arith.constant 0 : index
    %12 = vector.load %arg4[%c0_17, %c56, %c0_18] : memref<1x200x256xf32, #tpu.memory_space<vmem>>, vector<1x16x256xf32>
    tpu.vector_store %arg4[%c0_17, %c56, %c0_18], %2 {strides = array<i32>} : memref<1x200x256xf32, #tpu.memory_space<vmem>>, vector<1x16x256xf32>,
    %c0_19 = arith.constant 0 : index
    %c72 = arith.constant 72 : index
    %c0_20 = arith.constant 0 : index
    %13 = vector.load %arg4[%c0_19, %c72, %c0_20] : memref<1x200x256xf32, #tpu.memory_space<vmem>>, vector<1x16x256xf32>
    tpu.vector_store %arg4[%c0_19, %c72, %c0_20], %2 {strides = array<i32>} : memref<1x200x256xf32, #tpu.memory_space<vmem>>, vector<1x16x256xf32>,
    %c0_21 = arith.constant 0 : index
    %c88 = arith.constant 88 : index
    %c0_22 = arith.constant 0 : index
    %14 = vector.load %arg4[%c0_21, %c88, %c0_22] : memref<1x200x256xf32, #tpu.memory_space<vmem>>, vector<1x16x256xf32>
    tpu.vector_store %arg4[%c0_21, %c88, %c0_22], %2 {strides = array<i32>} : memref<1x200x256xf32, #tpu.memory_space<vmem>>, vector<1x16x256xf32>,
    %c0_23 = arith.constant 0 : index
    %c104 = arith.constant 104 : index
    %c0_24 = arith.constant 0 : index
    %15 = vector.load %arg4[%c0_23, %c104, %c0_24] : memref<1x200x256xf32, #tpu.memory_space<vmem>>, vector<1x16x256xf32>
    tpu.vector_store %arg4[%c0_23, %c104, %c0_24], %2 {strides = array<i32>} : memref<1x200x256xf32, #tpu.memory_space<vmem>>, vector<1x16x256xf32>,
    %c0_25 = arith.constant 0 : index
    %c120 = arith.constant 120 : index
    %c0_26 = arith.constant 0 : index
    %16 = vector.load %arg4[%c0_25, %c120, %c0_26] : memref<1x200x256xf32, #tpu.memory_space<vmem>>, vector<1x16x256xf32>
    tpu.vector_store %arg4[%c0_25, %c120, %c0_26], %2 {strides = array<i32>} : memref<1x200x256xf32, #tpu.memory_space<vmem>>, vector<1x16x256xf32>,
    return
  }
  func.func @transform_0(%arg0: i32) -> (i32, i32, i32) {
    %c0_i32 = arith.constant 0 : i32
    %c0_i32_0 = arith.constant 0 : i32
    %c0_i32_1 = arith.constant 0 : i32
    return %arg0, %c0_i32, %c0_i32_0 : i32, i32, i32
  }
  func.func @transform_1(%arg0: i32) -> (i32, i32) {
    %c0_i32 = arith.constant 0 : i32
    %c0_i32_0 = arith.constant 0 : i32
    %c0_i32_1 = arith.constant 0 : i32
    return %c0_i32, %c0_i32_0 : i32, i32
  }
  func.func @transform_2(%arg0: i32) -> (i32, i32) {
    %c0_i32 = arith.constant 0 : i32
    %c0_i32_0 = arith.constant 0 : i32
    %c0_i32_1 = arith.constant 0 : i32
    return %c0_i32, %c0_i32_0 : i32, i32
  }
  func.func @transform_3(%arg0: i32) -> (i32, i32, i32) {
    %c0_i32 = arith.constant 0 : i32
    %c0_i32_0 = arith.constant 0 : i32
    %c0_i32_1 = arith.constant 0 : i32
    return %arg0, %c0_i32, %c0_i32_0 : i32, i32, i32
  }
}

</mosaic_0001>

<bundles_post_ra>
// kernel: tpu_custom_call.1
= control target key start
LH: loop header
LB: loop body
LE: loop exit
PB: predicated region body
PF: predicated region fallthrough
CT: control target
= control target key end

     0   :  { %8 = vsyncpa [#allocation3], 0  ;;  %s919_s0 = inlined_call_operand.hbm [shape: f32[2,16,256], index: 0, kind: input, shape index: {}]   ;;  %s920_s1 = inlined_call_operand.hbm [shape: f32[8,256], index: 1, kind: input, shape index: {}]   ;;  %s921_s2 = inlined_call_operand.hbm [shape: f32[64,256], index: 2, kind: input, shape index: {}]   ;;  %s922_s3 = inlined_call_operand.hbm [shape: f32[2,200,256], index: 3, kind: output, shape index: {}]  }
   0x1   :  { %10 = vsyncpa [#allocation3 + $0x1], 0 }
   0x2   :  { %11 = vsyncpa [#allocation6], 0 }
   0x3   :  { %12 = vsyncpa [#allocation4], 0 }
   0x4   :  { %14 = vsyncpa [#allocation4 + $0x1], 0  ;;  %s661_s12 = smov 0   ;;  %s663_s13 = smov 0  }
   0x5   :  { %s665_s14 = smov 0   ;;  %s667_s15 = smov 0  }
   0x6 LB: > { %s682_s16 = sadd.s32 4294967295, %s631_s15   ;;  %s394_s17 = sadd.s32 4294967294, %s631_s15   ;;  %s631_s15 = sphi %s667_s15, %s945_s15   ;;  %s627_s14 = sphi %s665_s14, %s944_s14   ;;  %s623_s13 = sphi %s663_s13, %s943_s13   ;;  %s619_s12 = sphi %s661_s12, %s942_s12  }
   0x7   : > { %s686_s18 = sadd.s32 1, %s631_s15   ;;  %s27_s19 = sadd.s32 1, %s627_s14 }
   0x8   : > { %s24_s20 = ssub.s32 %s631_s15, %s686_s18  ;;  %p34_p0 = scmp.ne.s32.totalorder %s627_s14, %s623_s13 }
   0x9   : > { %p25_p1 = scmp.eq.s32.totalorder %s24_s20, 0  ;;  %p35_p2 = scmp.eq.s32.totalorder %s631_s15, 0 }
   0xa   : > { %p40_p3 = scmp.ne.s32.totalorder %s623_s13, %s619_s12  ;;  %p923_p4 = scmp.eq.s32.totalorder %s682_s16, 0 }
   0xb   : > { %s698_s21 = scalar_select %p25_p1, %s627_s14, %s27_s19  }
   0xc   : > { %p700_p5 = por %p35_p2, %p34_p0  ;;  %p706_p6 = por %p923_p4, %p40_p3 }
   0xd   : > { %p106_p7 = scmp.eq.s32.totalorder %s682_s16, 1  ;;  %p112_p8 = scmp.eq.s32.totalorder %s394_s17, 1 }
   0xe   : > { %s928_s23 = scalar_select %p706_p6, 1, 0 }
   0xf   : > { %p395_p9 = scmp.ge.s32.totalorder %s631_s15, 1  ;;  %p119_p10 = scmp.lt.s32.totalorder %s631_s15, 3 }
  0x10   : > { %p713_p11 = por %p106_p7, %p34_p0  ;;  %p717_p12 = por %p112_p8, %p40_p3 }
  0x11   : > { %p721_p13 = pnand %p395_p9, %p119_p10  ;;  %s633_s27 = smov [#allocation5]  }
  0x12   : > { %s929_s24 = scalar_select %p713_p11, 1, 0 }
  0x13   : > { %s930_s25 = scalar_select %p717_p12, 1, 0 }
  0x14   : > { %s931_s26 = scalar_select %p721_p13, 1, 0 }
  0x15   : > { %p424_p2 = pneg %p721_p13  ;;  %s132_s28 = sshll.u32 %s633_s27, 4  ;;  %s133_s28 = int_to_ptr.vmem [resolvable:$true] %s132_s28 }
  0x16   : > { %p441_p4 = scmp.lt.s32.totalorder %s631_s15, 2  ;;  %p932_p0 = scmp.eq.s32.totalorder %s682_s16, 0 }
  0x17   : > { %s634_s4 = smov [#allocation7]   ;;  %s494_s6 = scalar_lea.vmem %s133_s28, 256 }
  0x18   : > { %p731_p7 = pnand %p424_p2, %p932_p0  ;;  %p737_p3 = pnand %p441_p4, %p700_p5 }
  0x19   : > { %s142_s5 = sshll.u32 %s634_s4, 4  ;;  %p495_p9 = scmp.ne.s32.totalorder %s133_s28, %s494_s6  ;;  %s143_s5 = int_to_ptr.vmem [resolvable:$true] %s142_s5 }
  0x1a   : > { %p485_p8 = pneg %p731_p7  ;;  %p502_p0 = scmp.lt.s32.totalorder %s133_s28, %s133_s28 }
  0x1b   : > { %p503_p1 = scmp.lt.s32.totalorder %s494_s6, %s494_s6 }
  0x1c   : > { %p497_p10 = pnand %p495_p9, %p485_p8 }
  0x1d   : > { %p504_p12 = por %p503_p1, %p502_p0 }
  0x1e   : > { %p498_p2 = pneg %p497_p10 }
  0x20   : > { %p505_p11 = pnand %p504_p12, %p498_p2 }
  0x22   : > { %508 = shalt.err (!%p505_p11)
}
  0x23   : > { %427 = dma.hbm_to_vmem [thread:$0]  (!%p731_p7), %s920_s1, 256, %s133_s28, [#allocation6]  }
  0x24   : > { %s156_s9 = sand.u32 1, %s627_s14   ;;  %s520_s10 = scalar_lea.vmem %s143_s5, 2048 }
  0x25   : > { %p521_p4 = scmp.ne.s32.totalorder %s143_s5, %s520_s10  ;;  %p528_p10 = scmp.lt.s32.totalorder %s143_s5, %s143_s5 }
  0x26   : > { %p529_p6 = scmp.lt.s32.totalorder %s520_s10, %s520_s10 }
  0x27   : > { %p523_p5 = pnand %p521_p4, %p485_p8 }
  0x28   : > { %p530_p1 = por %p529_p6, %p528_p10 }
  0x29   : > { %p524_p9 = pneg %p523_p5 }
  0x2b   : > { %p531_p12 = pnand %p530_p1, %p524_p9 }
  0x2d   : > { %534 = shalt.err (!%p531_p12)
}
  0x2e   : > { %s635_s11 = smov 256   ;;  %s636_s17 = smov 16  }
  0x2f   : > { %430 = dma.hbm_to_vmem [thread:$0]  (!%p731_p7), %s921_s2, 2048, %s143_s5, [#allocation6], %s635_s11, %s635_s11, %s636_s17  }
  0x30   : > { %s399_s22 = sshll.u32 %s156_s9, 5  ;;  %s409_s27 = sshll.u32 %s631_s15, 9 }
  0x31   : > { %s767_s6 = scalar_lea.hbm %s919_s0, %s409_s27  ;;  %s160_s7 = scalar_lea.vmem [#allocation2], %s399_s22 }
  0x32   : > { %s167_s8 = sshll.u32 %s160_s7, 4  ;;  %s771_s29 = scalar_lea.sflag [#allocation3], %s156_s9  ;;  %s769_s8 = int_to_ptr.vmem [resolvable:$true] %s167_s8 }
  0x33   : > { %s535_s10 = scalar_lea.hbm %s767_s6, 512  ;;  %p537_p11 = pneg %p737_p3 }
  0x34   : > { %p536_p6 = scmp.ne.s32.totalorder %s767_s6, %s535_s10  ;;  %s540_s20 = scalar_lea.hbm %s919_s0, 1024 }
  0x35   : > { %p541_p2 = scmp.lt.s32.totalorder %s767_s6, %s919_s0  ;;  %p542_p0 = scmp.lt.s32.totalorder %s540_s20, %s535_s10 }
  0x36   : > { %p538_p7 = pnand %p537_p11, %p536_p6 }
  0x37   : > { %p543_p4 = por %p542_p0, %p541_p2 }
  0x38   : > { %p539_p8 = pneg %p538_p7 }
  0x3a   : > { %p544_p5 = pnand %p543_p4, %p539_p8 }
  0x3c   : > { %547 = shalt.err (!%p544_p5)
}
  0x3d   : > { %s548_s9 = scalar_lea.vmem %s769_s8, 512  ;;  %s637_s22 = smov [#allocation2]  }
  0x3e   : > { %p549_p9 = scmp.ne.s32.totalorder %s769_s8, %s548_s9  ;;  %s553_s4 = sshll.u32 %s637_s22, 4  ;;  %s554_s4 = int_to_ptr.vmem [resolvable:$false] %s553_s4 }
  0x3f   : > { %s555_s7 = scalar_lea.vmem %s554_s4, 1024  ;;  %p556_p12 = scmp.lt.s32.totalorder %s769_s8, %s554_s4 }
  0x40   : > { %p551_p10 = pnand %p549_p9, %p537_p11  ;;  %p557_p6 = scmp.lt.s32.totalorder %s555_s7, %s548_s9 }
  0x42   : > { %p552_p1 = pneg %p551_p10  ;;  %p558_p7 = por %p557_p6, %p556_p12 }
  0x44   : > { %p559_p13 = pnand %p558_p7, %p552_p1 }
  0x46   : > { %562 = shalt.err (!%p559_p13)
}
  0x47   : > { %434 = dma.hbm_to_vmem [thread:$0]  (!%p737_p3), %s767_s6, 512, %s769_s8, %s771_s29, %s635_s11, %s635_s11, %s636_s17  }
  0x48   : > { %p935_p11 = scmp.ne.s32.totalorder %s931_s26, 0 }
  0x49   : > { %s798_s10 = sand.u32 (!%p935_p11), 1, %s623_s13   ;;  %p936_p13 = scmp.ne.s32.totalorder (!%p935_p11), %s928_s23, 0 }
  0x4a   : > { %179 = sbr.rel (%p935_p11) target bundleno = 124 (0x7c), region = 32  ;;  %s403_s5 = sshll.u32 (!%p935_p11), %s798_s10, 5 }
  0x4b   : > { %s182_s19 = scalar_lea.sflag (!%p935_p11), [#allocation3], %s798_s10  ;;  %s802_s20 = scalar_lea.vmem (!%p935_p11), [#allocation2], %s403_s5 }
  0x4f   : > { %606 = dma.done.wait (%p936_p13), %s182_s19, 512  }
  0x50   : > { %608 = vsyncadd (%p936_p13), %s182_s19, 4294966784  ;;  %p937_p3 = scmp.eq.s32.totalorder %s682_s16, 0 }
  0x52   : > { %610 = dma.done.wait (%p937_p3), [#allocation6], 2304   ;;  %p938_p8 = pmov %p937_p3 }
  0x53   : > { %s410_s26 = smul.u32 400, %s798_s10  ;;  %v216_v0 = vld [vmem:[#allocation5] sm:$0xff]  ;;  %v217_v1 = vld [vmem:[#allocation5 + $0x8] sm:$0xff]  ;;  %v218_v2 = vld [vmem:[#allocation7] sm:$0xff]  ;;  %s289_s8 = scalar_lea.sflag [#allocation4], %s798_s10 }
  0x54   : > { %612 = vsyncadd (%p938_p8), [#allocation6], 4294964992  ;;  %v219_v3 = vld [vmem:[#allocation7 + $0x8] sm:$0xff]  ;;  %v220_v4 = vld [vmem:[#allocation7 + $0x10] sm:$0xff]  ;;  %s411_s23 = smul.u32 6400, %s682_s16  ;;  %p939_p0 = scmp.ne.s32.totalorder %s929_s24, 0 }
  0x55   : > { %s813_s30 = scalar_lea.vmem [#allocation8], %s410_s26  ;;  %v221_v5 = vld [vmem:[#allocation7 + $0x18] sm:$0xff]  ;;  %v222_v6 = vld [vmem:[#allocation7 + $0x20] sm:$0xff]  ;;  %v223_v7 = vld [vmem:[#allocation7 + $0x28] sm:$0xff]  ;;  %s638_s27 = smov [#allocation8]  }
  0x56   : > { %238 = vst [vmem:[%s813_s30] sm:$0xff] %v216_v0  ;;  %239 = vst [vmem:[%s813_s30 + $0x8] sm:$0xff] %v217_v1  ;;  %v224_v8 = vld [vmem:[#allocation7 + $0x30] sm:$0xff]  ;;  %v225_v9 = vld [vmem:[#allocation7 + $0x38] sm:$0xff]  ;;  %s302_s11 = sshll.u32 %s813_s30, 4  ;;  %s841_s6 = scalar_lea.hbm %s922_s3, %s411_s23  ;;  %s843_s11 = int_to_ptr.vmem [resolvable:$true] %s302_s11 }
  0x57   : > { %240 = vst [vmem:[%s813_s30 + $0x110] sm:$0xff] %v218_v2  ;;  %241 = vst [vmem:[%s813_s30 + $0x118] sm:$0xff] %v219_v3  ;;  %v226_v10 = vld [vmem:[#allocation7 + $0x40] sm:$0xff]  ;;  %v227_v11 = vld [vmem:[#allocation7 + $0x48] sm:$0xff]  ;;  %s563_s29 = scalar_lea.vmem %s843_s11, 6400  ;;  %s567_s28 = sshll.u32 %s638_s27, 4  ;;  %s568_s28 = int_to_ptr.vmem [resolvable:$false] %s567_s28 }
  0x58   : > { %242 = vst [vmem:[%s813_s30 + $0x120] sm:$0xff] %v220_v4  ;;  %243 = vst [vmem:[%s813_s30 + $0x128] sm:$0xff] %v221_v5  ;;  %v228_v12 = vld [vmem:[#allocation7 + $0x50] sm:$0xff]  ;;  %v229_v13 = vld [vmem:[#allocation7 + $0x58] sm:$0xff]  ;;  %p564_p2 = scmp.ne.s32.totalorder %s843_s11, %s563_s29  ;;  %s569_s9 = scalar_lea.vmem %s568_s28, 12800 }
  0x59   : > { %244 = vst [vmem:[%s813_s30 + $0x130] sm:$0xff] %v222_v6  ;;  %245 = vst [vmem:[%s813_s30 + $0x138] sm:$0xff] %v223_v7  ;;  %v230_v14 = vld [vmem:[#allocation7 + $0x60] sm:$0xff]  ;;  %v231_v15 = vld [vmem:[#allocation7 + $0x68] sm:$0xff]  ;;  %p570_p9 = scmp.lt.s32.totalorder %s843_s11, %s568_s28  ;;  %p571_p10 = scmp.lt.s32.totalorder %s569_s9, %s563_s29 }
  0x5a   : > { %246 = vst [vmem:[%s813_s30 + $0x140] sm:$0xff] %v224_v8  ;;  %247 = vst [vmem:[%s813_s30 + $0x148] sm:$0xff] %v225_v9  ;;  %v232_v16 = vld [vmem:[#allocation7 + $0x70] sm:$0xff]  ;;  %v233_v17 = vld [vmem:[#allocation7 + $0x78] sm:$0xff]  ;;  %p565_p4 = pnand %p564_p2, %p939_p0 }
  0x5b   : > { %248 = vst [vmem:[%s813_s30 + $0x150] sm:$0xff] %v226_v10  ;;  %249 = vst [vmem:[%s813_s30 + $0x158] sm:$0xff] %v227_v11  ;;  %v234_v18 = vld [vmem:[%s802_s20] sm:$0xff]  ;;  %v235_v19 = vld [vmem:[%s802_s20 + $0x8] sm:$0xff]  ;;  %p572_p1 = por %p571_p10, %p570_p9 }
  0x5c   : > { %250 = vst [vmem:[%s813_s30 + $0x160] sm:$0xff] %v228_v12  ;;  %251 = vst [vmem:[%s813_s30 + $0x168] sm:$0xff] %v229_v13  ;;  %v236_v20 = vld [vmem:[%s802_s20 + $0x10] sm:$0xff]  ;;  %v237_v21 = vld [vmem:[%s802_s20 + $0x18] sm:$0xff]  ;;  %p566_p5 = pneg %p565_p4 }
  0x5d   : > { %252 = vst [vmem:[%s813_s30 + $0x170] sm:$0xff] %v230_v14  ;;  %253 = vst [vmem:[%s813_s30 + $0x178] sm:$0xff] %v231_v15 }
  0x5e   : > { %254 = vst [vmem:[%s813_s30 + $0x180] sm:$0xff] %v232_v16  ;;  %255 = vst [vmem:[%s813_s30 + $0x188] sm:$0xff] %v233_v17  ;;  %p573_p12 = pnand %p572_p1, %p566_p5 }
  0x5f   : > { %256 = vst [vmem:[%s813_s30 + $0x10] sm:$0xff] %v234_v18  ;;  %260 = vst [vmem:[%s813_s30 + $0x30] sm:$0xff] %v234_v18 }
  0x60   : > { %264 = vst [vmem:[%s813_s30 + $0x50] sm:$0xff] %v234_v18  ;;  %268 = vst [vmem:[%s813_s30 + $0x70] sm:$0xff] %v234_v18 }
  0x61   : > { %272 = vst [vmem:[%s813_s30 + $0x90] sm:$0xff] %v234_v18  ;;  %276 = vst [vmem:[%s813_s30 + $0xb0] sm:$0xff] %v234_v18 }
  0x62   : > { %280 = vst [vmem:[%s813_s30 + $0xd0] sm:$0xff] %v234_v18  ;;  %284 = vst [vmem:[%s813_s30 + $0xf0] sm:$0xff] %v234_v18 }
  0x63   : > { %257 = vst [vmem:[%s813_s30 + $0x18] sm:$0xff] %v235_v19  ;;  %261 = vst [vmem:[%s813_s30 + $0x38] sm:$0xff] %v235_v19 }
  0x64   : > { %265 = vst [vmem:[%s813_s30 + $0x58] sm:$0xff] %v235_v19  ;;  %269 = vst [vmem:[%s813_s30 + $0x78] sm:$0xff] %v235_v19 }
  0x65   : > { %273 = vst [vmem:[%s813_s30 + $0x98] sm:$0xff] %v235_v19  ;;  %277 = vst [vmem:[%s813_s30 + $0xb8] sm:$0xff] %v235_v19 }
  0x66   : > { %281 = vst [vmem:[%s813_s30 + $0xd8] sm:$0xff] %v235_v19  ;;  %285 = vst [vmem:[%s813_s30 + $0xf8] sm:$0xff] %v235_v19 }
  0x67   : > { %258 = vst [vmem:[%s813_s30 + $0x20] sm:$0xff] %v236_v20  ;;  %262 = vst [vmem:[%s813_s30 + $0x40] sm:$0xff] %v236_v20 }
  0x68   : > { %266 = vst [vmem:[%s813_s30 + $0x60] sm:$0xff] %v236_v20  ;;  %270 = vst [vmem:[%s813_s30 + $0x80] sm:$0xff] %v236_v20 }
  0x69   : > { %274 = vst [vmem:[%s813_s30 + $0xa0] sm:$0xff] %v236_v20  ;;  %278 = vst [vmem:[%s813_s30 + $0xc0] sm:$0xff] %v236_v20 }
  0x6a   : > { %282 = vst [vmem:[%s813_s30 + $0xe0] sm:$0xff] %v236_v20  ;;  %286 = vst [vmem:[%s813_s30 + $0x100] sm:$0xff] %v236_v20 }
  0x6b   : > { %259 = vst [vmem:[%s813_s30 + $0x28] sm:$0xff] %v237_v21  ;;  %263 = vst [vmem:[%s813_s30 + $0x48] sm:$0xff] %v237_v21 }
  0x6c   : > { %267 = vst [vmem:[%s813_s30 + $0x68] sm:$0xff] %v237_v21  ;;  %271 = vst [vmem:[%s813_s30 + $0x88] sm:$0xff] %v237_v21 }
  0x6d   : > { %275 = vst [vmem:[%s813_s30 + $0xa8] sm:$0xff] %v237_v21  ;;  %279 = vst [vmem:[%s813_s30 + $0xc8] sm:$0xff] %v237_v21 }
  0x6e   : > { %283 = vst [vmem:[%s813_s30 + $0xe8] sm:$0xff] %v237_v21  ;;  %287 = vst [vmem:[%s813_s30 + $0x108] sm:$0xff] %v237_v21 }
  0x6f   : > { %576 = shalt.err (!%p573_p12)
}
  0x70   : > { %s577_s22 = scalar_lea.hbm %s841_s6, 6400  ;;  %s581_s5 = scalar_lea.hbm %s922_s3, 12800 }
  0x71   : > { %p578_p6 = scmp.ne.s32.totalorder %s841_s6, %s577_s22  ;;  %p582_p13 = scmp.lt.s32.totalorder %s841_s6, %s922_s3 }
  0x72   : > { %p583_p3 = scmp.lt.s32.totalorder %s581_s5, %s577_s22 }
  0x73   : > { %p579_p7 = pnand %p578_p6, %p939_p0 }
  0x74   : > { %p584_p8 = por %p583_p3, %p582_p13 }
  0x75   : > { %p580_p11 = pneg %p579_p7 }
  0x77   : > { %p585_p2 = pnand %p584_p8, %p580_p11 }
  0x79   : > { %588 = shalt.err (!%p585_p2)
}
  0x7a   : > { %s639_s26 = smov 256   ;;  %s640_s30 = smov 16  }
  0x7b   : > { %422 = dma.vmem_to_hbm [thread:$0]  (%p939_p0), %s843_s11, 6400, %s841_s6, %s289_s8, %s639_s26, %s639_s26, %s640_s30  }
  0x7c PF: > { %s317_s23 = sand.u32 1, %s619_s12   ;;  %p940_p4 = scmp.ne.s32.totalorder %s930_s25, 0 }
  0x7d   : > { %p941_p5 = scmp.ge.s32.totalorder %s631_s15, 2  ;;  %s318_s16 = scalar_lea.sflag [#allocation4], %s317_s23 }
  0x7f   : > { %p436_p9 = pnand %p941_p5, %p940_p4 }
  0x81   : > { %p437_p10 = pneg %p436_p9 }
  0x83   : > { %614 = dma.done.wait (%p437_p10), %s318_s16, 6400  }
  0x84   : > { %616 = vsyncadd (%p437_p10), %s318_s16, 4294960896  ;;  %p17_p1 = scmp.ge.s32.totalorder %s686_s18, 4   ;;  %s942_s12 = smov %s623_s13 }
  0x85   : > { %s943_s13 = smov %s627_s14  ;;  %s944_s14 = smov %s698_s21 }
  0x86   : > { %s945_s15 = smov %s686_s18  ;;  %19 = sbr.rel (!%p17_p1) target bundleno = 6 (0x6), region = 85 }
  0x8b   :  { %323 = vsyncpa [#allocation3], 1 }
  0x8c   :  { %325 = vsyncpa [#allocation3 + $0x1], 1 }
  0x8d   :  { %326 = vsyncpa [#allocation6], 1 }
  0x8e   :  { %327 = vsyncpa [#allocation4], 1 }
  0x8f   :  { %329 = vsyncpa [#allocation4 + $0x1], 1 }

</bundles_post_ra>
